<compile_context>
chip_gen: v7x
topology: tpu7x:2x2x1
jax: 0.10.0
libtpu: 0.0.40
codegen_flags: <defaults>
</compile_context>

<pallas_src>
import jax
import jax.numpy as jnp
from jax.experimental import pallas as pl
from jax.experimental.pallas import tpu as pltpu


def _round_up(x, m):
    return ((x + m - 1) // m) * m


def _linlayer_kernel(x_ref, w_ref, p_ref, o_ref):
    # Linear: x @ W  on the MXU, f32 accumulation regardless of operand dtype.
    y = jnp.dot(x_ref[...], w_ref[...], preferred_element_type=jnp.float32)
    # p_ref is (3, block_n): row 0 = bias, row 1 = BN scale, row 2 = BN shift.
    y = y + p_ref[0:1, :]                    # bias (pre-ReLU), broadcasts over rows
    y = jnp.maximum(y, 0.0)                  # ReLU (VPU)
    y = y * p_ref[1:2, :] + p_ref[2:3, :]    # BatchNorm1d (eval) folded affine
    # Dropout: identity at inference.
    o_ref[...] = y.astype(o_ref.dtype)


def lin_layer_forward(x, w, b, gamma, beta, running_mean, running_var,
                      eps=1e-3, block_b=None, block_n=None, mxu_dtype=None):
    """x: (B, IN). w: (IN, OUT). Returns (B, OUT) float32 (eval-mode LinLayer)."""
    B, IN = x.shape
    OUT = w.shape[1]

    # Fold BN running stats into per-feature affine (parameter glue, f32).
    scale = gamma / jnp.sqrt(running_var + eps)
    shift = beta - running_mean * scale
    params = jnp.stack([b, scale, shift], axis=0).astype(jnp.float32)   # (3, OUT)

    # ---- tile selection (adaptive, MXU-shaped) ----
    if block_b is None:
        block_b = min(_round_up(B, 8), 256)       # big batch tiles, 8-aligned
    if block_n is None:
        block_n = min(_round_up(OUT, 128), 256)   # lane-dense output stripes

    B_pad = _round_up(B, block_b)
    OUT_pad = _round_up(OUT, block_n)

    # Optional low-precision MXU operands (v6e/v7x); epilogue stays f32.
    if mxu_dtype is not None:
        x = x.astype(mxu_dtype)
        w = w.astype(mxu_dtype)

    if B_pad != B:
        x = jnp.pad(x, ((0, B_pad - B), (0, 0)))
    if OUT_pad != OUT:
        w = jnp.pad(w, ((0, 0), (0, OUT_pad - OUT)))
        params = jnp.pad(params, ((0, 0), (0, OUT_pad - OUT)))

    # Grid: OUT stripes outer, batch tiles inner -> weight stripe stays resident
    # (constant block index) across consecutive batch iterations.
    grid = (OUT_pad // block_n, B_pad // block_b)

    # VMEM budget (double-buffered operands + output); only raise the scoped
    # limit when the chosen tiles actually need it (keeps v7x's 64 MiB safe).
    in_itemsize = jnp.dtype(x.dtype).itemsize
    vmem_need = 2 * (block_b * IN * in_itemsize      # x tile
                     + IN * block_n * in_itemsize    # weight stripe
                     + 3 * block_n * 4               # packed bias/scale/shift
                     + block_b * block_n * 4)        # output tile
    vmem_limit = int(vmem_need * 3 // 2) if vmem_need > (32 << 20) else None

    out = pl.pallas_call(
        _linlayer_kernel,
        out_shape=jax.ShapeDtypeStruct((B_pad, OUT_pad), jnp.float32),
        grid_spec=pltpu.PrefetchScalarGridSpec(
            num_scalar_prefetch=0,
            grid=grid,
            in_specs=[
                pl.BlockSpec((block_b, IN), lambda j, i: (i, 0)),   # x row tile
                pl.BlockSpec((IN, block_n), lambda j, i: (0, j)),   # weight stripe
                pl.BlockSpec((3, block_n),  lambda j, i: (0, j)),   # bias/scale/shift
            ],
            out_specs=pl.BlockSpec((block_b, block_n), lambda j, i: (i, j)),
        ),
        compiler_params=pltpu.CompilerParams(
            dimension_semantics=("parallel", "parallel"),
            vmem_limit_bytes=vmem_limit),
    )(x, w, params)

    return out[:B, :OUT]


if __name__ == "__main__":
    B, IN, OUT = 16, 32, 64
    key = jax.random.PRNGKey(0)
    kx, kw, kb, kg, kbe, km, kv = jax.random.split(key, 7)

    x = jax.random.normal(kx, (B, IN), dtype=jnp.float32)

    # Deterministic parameter init (shapes from nn.Linear(IN,OUT), BatchNorm1d(OUT)).
    w = jax.random.normal(kw, (IN, OUT), dtype=jnp.float32) * 0.1
    b = jax.random.normal(kb, (OUT,), dtype=jnp.float32) * 0.1
    gamma = 1.0 + 0.1 * jax.random.normal(kg, (OUT,), dtype=jnp.float32)
    beta = 0.1 * jax.random.normal(kbe, (OUT,), dtype=jnp.float32)
    running_mean = 0.1 * jax.random.normal(km, (OUT,), dtype=jnp.float32)
    running_var = jnp.abs(1.0 + 0.1 * jax.random.normal(kv, (OUT,), dtype=jnp.float32))

    # f32 path (default).
    out = lin_layer_forward(x, w, b, gamma, beta, running_mean, running_var)
    jax.block_until_ready(out)

    # Reference check in plain JAX (eval-mode semantics).
    y_ref = jnp.maximum(x @ w + b, 0.0)
    y_ref = gamma * (y_ref - running_mean) / jnp.sqrt(running_var + 1e-3) + beta
    assert out.shape == (B, OUT)
    assert jnp.allclose(out, y_ref, atol=1e-5, rtol=1e-5)

    # bf16-MXU path (v6e/v7x optimization); f32 accumulate + f32 epilogue.
    out_bf16 = lin_layer_forward(x, w, b, gamma, beta, running_mean, running_var,
                                 mxu_dtype=jnp.bfloat16)
    jax.block_until_ready(out_bf16)
    assert jnp.allclose(out_bf16, y_ref, atol=1e-1, rtol=1e-1)

    print("KERNEL_OK")
</pallas_src>

<mosaic_0001>
module attributes {stable_mosaic.version = 11 : i64} {
  func.func @_linlayer_kernel(%arg0: i32, %arg1: i32, %arg2: memref<16x32xf32, #tpu.memory_space<vmem>>, %arg3: memref<32x128xf32, #tpu.memory_space<vmem>>, %arg4: memref<3x128xf32, #tpu.memory_space<vmem>>, %arg5: memref<16x128xf32, #tpu.memory_space<vmem>>) attributes {dimension_semantics = [#tpu.dimension_semantics<parallel>, #tpu.dimension_semantics<parallel>], iteration_bounds = array<i64: 1, 1>, scalar_prefetch = 0 : i64, scratch_operands = 0 : i64, tpu.core_type = #tpu.core_type<tc>, window_params = [{transform_indices = @transform_0, window_bounds = array<i64: 16, 32>}, {transform_indices = @transform_1, window_bounds = array<i64: 32, 128>}, {transform_indices = @transform_2, window_bounds = array<i64: 3, 128>}, {transform_indices = @transform_3, window_bounds = array<i64: 16, 128>}]} {
    %c0 = arith.constant 0 : index
    %c0_0 = arith.constant 0 : index
    %0 = vector.load %arg2[%c0, %c0_0] : memref<16x32xf32, #tpu.memory_space<vmem>>, vector<16x32xf32>
    %c0_1 = arith.constant 0 : index
    %c0_2 = arith.constant 0 : index
    %1 = vector.load %arg3[%c0_1, %c0_2] : memref<32x128xf32, #tpu.memory_space<vmem>>, vector<32x128xf32>
    %cst = arith.constant dense<0.000000e+00> : vector<16x128xf32>
    %2 = tpu.matmul %0, %1, %cst {dimension_numbers = #tpu.dot_dimension_numbers<[1], [0], [0], [1], [0, 0, 1, 1], [], []>} : vector<16x32xf32>, vector<32x128xf32>, vector<16x128xf32> -> vector<16x128xf32>
    %c0_3 = arith.constant 0 : index
    %c0_4 = arith.constant 0 : index
    %3 = vector.load %arg4[%c0_3, %c0_4] : memref<3x128xf32, #tpu.memory_space<vmem>>, vector<1x128xf32>
    %4 = vector.broadcast %3 : vector<1x128xf32> to vector<16x128xf32>
    %5 = arith.addf %2, %4 : vector<16x128xf32>
    %cst_5 = arith.constant 0.000000e+00 : f32
    %6 = vector.broadcast %cst_5 : f32 to vector<16x128xf32>
    %7 = arith.maximumf %5, %6 : vector<16x128xf32>
    %c1 = arith.constant 1 : index
    %c0_6 = arith.constant 0 : index
    %8 = vector.load %arg4[%c1, %c0_6] : memref<3x128xf32, #tpu.memory_space<vmem>>, vector<1x128xf32>
    %9 = vector.broadcast %8 : vector<1x128xf32> to vector<16x128xf32>
    %10 = arith.mulf %7, %9 : vector<16x128xf32>
    %c2 = arith.constant 2 : index
    %c0_7 = arith.constant 0 : index
    %11 = vector.load %arg4[%c2, %c0_7] : memref<3x128xf32, #tpu.memory_space<vmem>>, vector<1x128xf32>
    %12 = vector.broadcast %11 : vector<1x128xf32> to vector<16x128xf32>
    %13 = arith.addf %10, %12 : vector<16x128xf32>
    %c0_8 = arith.constant 0 : index
    %c0_9 = arith.constant 0 : index
    %14 = vector.load %arg5[%c0_8, %c0_9] : memref<16x128xf32, #tpu.memory_space<vmem>>, vector<16x128xf32>
    tpu.vector_store %arg5[%c0_8, %c0_9], %13 {strides = array<i32>} : memref<16x128xf32, #tpu.memory_space<vmem>>, vector<16x128xf32>,
    return
  }
  func.func @transform_0(%arg0: i32, %arg1: i32) -> (i32, i32) {
    %c0_i32 = arith.constant 0 : i32
    %c0_i32_0 = arith.constant 0 : i32
    return %arg1, %c0_i32 : i32, i32
  }
  func.func @transform_1(%arg0: i32, %arg1: i32) -> (i32, i32) {
    %c0_i32 = arith.constant 0 : i32
    %c0_i32_0 = arith.constant 0 : i32
    return %c0_i32, %arg0 : i32, i32
  }
  func.func @transform_2(%arg0: i32, %arg1: i32) -> (i32, i32) {
    %c0_i32 = arith.constant 0 : i32
    %c0_i32_0 = arith.constant 0 : i32
    return %c0_i32, %arg0 : i32, i32
  }
  func.func @transform_3(%arg0: i32, %arg1: i32) -> (i32, i32) {
    %c0_i32 = arith.constant 0 : i32
    return %arg1, %arg0 : i32, i32
  }
}

</mosaic_0001>

<bundles_post_ra>
// kernel: tpu_custom_call.1
= control target key start
LH: loop header
LB: loop body
LE: loop exit
PB: predicated region body
PF: predicated region fallthrough
CT: control target
= control target key end

     0   :  { %8 = vsyncpa [#allocation3], 0  ;;  %s358_s0 = inlined_call_operand.hbm [shape: f32[16,32], index: 0, kind: input, shape index: {}]   ;;  %s359_s1 = inlined_call_operand.hbm [shape: f32[32,128], index: 1, kind: input, shape index: {}]   ;;  %s360_s2 = inlined_call_operand.vmem [shape: f32[3,128], index: 2, kind: input, shape index: {}]   ;;  %s361_s3 = inlined_call_operand.hbm [shape: f32[16,128], index: 3, kind: output, shape index: {}]  }
   0x1   :  { %9 = vsyncpa [#allocation6], 0 }
   0x2   :  { %10 = vsyncpa [#allocation4], 0  ;;  %s279_s12 = smov [#allocation2]   ;;  %s207_s16 = scalar_lea.hbm %s358_s0, 256 }
   0x3   :  { %s16_s13 = sshll.u32 %s279_s12, 4  ;;  %p208_p0 = scmp.ne.s32.totalorder %s358_s0, %s207_s16  ;;  %s17_s13 = int_to_ptr.vmem [resolvable:$true] %s16_s13 }
   0x4   :  { %p211_p1 = scmp.lt.u32.totalorder %s207_s16, %s358_s0 }
   0x6   :  { %p213_p2 = pnand %p211_p1, %p208_p0 }
   0x8   :  { %216 = shalt.err (!%p213_p2)
}
   0x9   :  { %s217_s21 = scalar_lea.vmem %s17_s13, 256  ;;  %p222_p4 = scmp.lt.s32.totalorder %s17_s13, %s17_s13 }
   0xa   :  { %p218_p3 = scmp.ne.s32.totalorder %s17_s13, %s217_s21  ;;  %p223_p5 = scmp.lt.s32.totalorder %s217_s21, %s217_s21 }
   0xc   :  { %p224_p6 = por %p223_p5, %p222_p4 }
   0xe   :  { %p225_p7 = pnand %p224_p6, %p218_p3 }
  0x10   :  { %228 = shalt.err (!%p225_p7)
}
  0x11   :  { %s280_s22 = smov 128   ;;  %s281_s23 = smov 8  }
  0x12   :  { %22 = dma.hbm_to_vmem [thread:$0]  %s358_s0, 256, %s17_s13, [#allocation3], %s280_s22, %s280_s22, %s281_s23  }
  0x13   :  { %s282_s26 = smov [#allocation5]   ;;  %s229_s30 = scalar_lea.hbm %s359_s1, 512 }
  0x14   :  { %s28_s27 = sshll.u32 %s282_s26, 4  ;;  %p230_p8 = scmp.ne.s32.totalorder %s359_s1, %s229_s30  ;;  %s29_s27 = int_to_ptr.vmem [resolvable:$true] %s28_s27 }
  0x15   :  { %p233_p9 = scmp.lt.u32.totalorder %s229_s30, %s359_s1 }
  0x17   :  { %p235_p10 = pnand %p233_p9, %p230_p8 }
  0x19   :  { %238 = shalt.err (!%p235_p10)
}
  0x1a   :  { %s239_s8 = scalar_lea.vmem %s29_s27, 512  ;;  %p244_p12 = scmp.lt.s32.totalorder %s29_s27, %s29_s27 }
  0x1b   :  { %p240_p11 = scmp.ne.s32.totalorder %s29_s27, %s239_s8  ;;  %p245_p13 = scmp.lt.s32.totalorder %s239_s8, %s239_s8 }
  0x1d   :  { %p246_p0 = por %p245_p13, %p244_p12 }
  0x1f   :  { %p247_p1 = pnand %p246_p0, %p240_p11 }
  0x21   :  { %250 = shalt.err (!%p247_p1)
}
  0x22   :  { %34 = dma.hbm_to_vmem [thread:$0]  %s359_s1, 512, %s29_s27, [#allocation6], %s280_s22, %s280_s22, %s281_s23  }
  0x23   :  { %273 = dma.done.wait [#allocation3], 256  }
  0x24   :  { %274 = vsyncadd [#allocation3], 4294967040 }
  0x25   :  { %275 = dma.done.wait [#allocation6], 512  }
  0x26   :  { %276 = vsyncadd [#allocation6], 4294966784  ;;  %vm54_vm0 = vcmask 261120   ;;  %v45_v0 = vld [vmem:[#allocation5] sm:$0xff]  ;;  %v46_v1 = vld [vmem:[#allocation5 + $0x8] sm:$0xff]  ;;  %s283_s15 = smov [#allocation7]  }
  0x27   :  { %v47_v2 = vld [vmem:[#allocation5 + $0x10] sm:$0xff]  ;;  %v194_v3 = vpack.c.bf16 %v46_v1, %v45_v0  ;;  %v48_v4 = vld [vmem:[#allocation5 + $0x18] sm:$0xff]  ;;  %s159_s16 = sshll.u32 %s283_s15, 4  ;;  %s160_s16 = int_to_ptr.vmem [resolvable:$true] %s159_s16 }
  0x28   :  { %v43_v5 = vld [vmem:[#allocation2] sm:$0xff]  ;;  %v198_v6 = vpack.c.bf16 %v48_v4, %v47_v2  ;;  %v44_v7 = vld [vmem:[#allocation2 + $0x8] sm:$0xff]  ;;  %s251_s17 = scalar_lea.vmem %s160_s16, 256  ;;  %p256_p3 = scmp.lt.s32.totalorder %s160_s16, %s160_s16 }
  0x29   :  { %191 = vmatprep.mubr.msk.f32.mxu0 %vm54_vm0, %v43_v5  ;;  %195 = vmatprep.subr.bf16.mxu0 %v194_v3  ;;  %v172_v8 = vld [vmem:[%s360_s2] ss:$0 sm:$0xff]  ;;  %v175_v12 = vld [vmem:[%s360_s2 + $0x1] ss:$0 sm:$0xff]  ;;  %v176_v15 = vld [vmem:[%s360_s2 + $0x2] ss:$0 sm:$0xff]  ;;  %p252_p2 = scmp.ne.s32.totalorder %s160_s16, %s251_s17  ;;  %p257_p4 = scmp.lt.s32.totalorder %s251_s17, %s251_s17 }
  0x2a   :  { %197 = vmatpush3.bf16.msra.mxu0 %v194_v3 }
  0x2b   :  { %199 = vmatprep.subr.bf16.mxu0 %v198_v6  ;;  %p258_p5 = por %p257_p4, %p256_p3 }
  0x2d   :  { %p259_p6 = pnand %p258_p5, %p252_p2 }
  0x2e   :  { %201 = vmatpush3.bf16.msra.mxu0 %v198_v6 }
  0x31   :  { %192 = vmatmul.mubr.msk.f32.vlgmr.msra.gmra.mrb[0].mxu0 %vm54_vm0, %v44_v7 }
 0x104   :  { %v193_v9 = vpop.f32.mrb[0].mxu0 }
 0x105   :  { %v133_v10 = vadd.f32 %v193_v9, %v172_v8  ;;  %v127_v11 = vpop.f32.mrb[1].mxu0 }
 0x106   :  { %v128_v13 = vadd.f32 %v172_v8, %v127_v11 }
 0x107   :  { %v137_v14 = vmax.f32 %v133_v10, 0.0 }
 0x108   :  { %v136_v16 = vmax.f32 %v128_v13, 0.0 }
 0x109   :  { %v144_v17 = vmul.f32 %v175_v12, %v137_v14 }
 0x10a   :  { %v143_v18 = vmul.f32 %v175_v12, %v136_v16 }
 0x10b   :  { %v151_v19 = vadd.f32 %v176_v15, %v144_v17 }
 0x10c   :  { %v150_v20 = vadd.f32 %v176_v15, %v143_v18 }
 0x10d   :  { %153 = vst [vmem:[#allocation7 + $0x8] sm:$0xff] %v151_v19 }
 0x10e   :  { %152 = vst [vmem:[#allocation7] sm:$0xff] %v150_v20 }
 0x10f   :  { %262 = shalt.err (!%p259_p6)
}
 0x110   :  { %s263_s2 = scalar_lea.hbm %s361_s3, 256 }
 0x111   :  { %p264_p7 = scmp.ne.s32.totalorder %s361_s3, %s263_s2  ;;  %p267_p8 = scmp.lt.u32.totalorder %s263_s2, %s361_s3 }
 0x113   :  { %p269_p9 = pnand %p267_p8, %p264_p7 }
 0x115   :  { %272 = shalt.err (!%p269_p9)
}
 0x116   :  { %165 = dma.vmem_to_hbm [thread:$0]  %s160_s16, 256, %s361_s3, [#allocation4], %s280_s22, %s280_s22, %s281_s23  }
 0x117   :  { %277 = dma.done.wait [#allocation4], 256  }
 0x118   :  { %278 = vsyncadd [#allocation4], 4294967040 }
 0x119   :  { %169 = vsyncpa [#allocation3], 1 }
 0x11a   :  { %170 = vsyncpa [#allocation6], 1 }
 0x11b   :  { %171 = vsyncpa [#allocation4], 1 }

</bundles_post_ra>
